<compile_context>
chip_gen: v5e
topology: v5e:2x2
jax: 0.10.0
libtpu: 0.0.40
codegen_flags: <defaults>
</compile_context>

<pallas_src>
import jax
import jax.numpy as jnp
from jax import lax
from jax.experimental import pallas as pl
from jax.experimental.pallas import tpu as pltpu


# Contract the last dim of x (tm, tk) with the last dim of w (tn, tk) -> (tm, tn).
# This is exactly x @ W^T without ever materializing a transposed copy of W.
_DOT_DIMS = (((1,), (1,)), ((), ()))


# ----------------------------- Pallas kernels ------------------------------ #
def _skip_fc_kernel_fused_k(x_ref, w_ref, xs_ref, o_ref):
    """Collapsed-K path: one MXU dot per output tile, fused ReLU + skip epilogue."""
    y = lax.dot_general(
        x_ref[...], w_ref[...],
        dimension_numbers=_DOT_DIMS,
        preferred_element_type=jnp.float32,
    )
    o_ref[...] = (jnp.maximum(y, 0.0) + xs_ref[...].astype(jnp.float32)).astype(o_ref.dtype)


def _skip_fc_kernel_ktiled(x_ref, w_ref, xs_ref, o_ref, acc_ref):
    """K-tiled path: persistent f32 accumulator, no zero-fill pass."""
    k = pl.program_id(2)
    part = lax.dot_general(
        x_ref[...], w_ref[...],
        dimension_numbers=_DOT_DIMS,
        preferred_element_type=jnp.float32,
    )

    @pl.when(k == 0)
    def _first():
        acc_ref[...] = part

    @pl.when(k > 0)
    def _accum():
        acc_ref[...] += part

    @pl.when(k == pl.num_programs(2) - 1)
    def _finalize():
        y = jnp.maximum(acc_ref[...], 0.0) + xs_ref[...].astype(jnp.float32)
        o_ref[...] = y.astype(o_ref.dtype)


# --------------------------------- wrapper --------------------------------- #
def _pick_tile(dim, candidates):
    """Largest candidate that evenly divides `dim`, else the full dim (legal block)."""
    for c in candidates:
        if c <= dim and dim % c == 0:
            return c
    return dim


def skip_fc_forward(x, w, *, tm=None, tn=None, tk=None,
                    matmul_dtype=jnp.bfloat16,
                    vmem_budget_bytes=24 * 1024 * 1024):
    """Pallas-backed SkipConnectionFCBlock.forward (bias=False, relu, no norm/dropout).

    x: (B, input_dim)
    w: (output_dim, input_dim)  -- PyTorch nn.Linear weight layout (NOT transposed)
    Returns: (B, output_dim) = relu(x @ w.T) + x, in x.dtype.
    """
    M, K = x.shape
    N, K_w = w.shape
    assert K == K_w, "weight in_features must match x feature dim"
    assert N == K, "skip connection requires input_dim == output_dim"

    # bf16 matmul operands (MXU full rate, half HBM bytes); skip addend stays f32/x.dtype.
    xm = x.astype(matmul_dtype)
    wm = w.astype(matmul_dtype)
    op_bytes = jnp.dtype(matmul_dtype).itemsize
    io_bytes = jnp.dtype(x.dtype).itemsize

    tm = tm or _pick_tile(M, (512, 256, 128, 64, 32, 16, 8))
    auto_tn = tn is None
    tn = tn or _pick_tile(N, (512, 256, 128))
    # v7x has 2 TensorCores: if the batch axis only yields one tile, make sure the
    # N ("parallel") axis has >= 2 tiles so both cores get work.
    if auto_tn and M // tm == 1 and N // tn < 2:
        for c in (N // 2, 256, 128):
            if c >= 128 and N % c == 0 and N // c >= 2:
                tn = c
                break

    def _footprint(tk_):
        return (2 * tm * tk_ * op_bytes       # x tiles (double-buffered)
                + 2 * tn * tk_ * op_bytes     # w tiles (double-buffered)
                + 2 * tm * tn * io_bytes      # skip-addend tiles
                + 2 * tm * tn * io_bytes      # output tiles
                + tm * tn * 4)                # f32 accumulator (K-tiled path only)

    if tk is None:
        # Prefer collapsing K entirely (drops accumulator + init/finalize + per-step overhead).
        if _footprint(K) <= vmem_budget_bytes:
            tk = K
        else:
            tk = _pick_tile(K, (2048, 1024, 512, 256, 128))

    fp = _footprint(tk)
    assert fp <= 48 * 1024 * 1024, (
        "tile footprint too large for VMEM; pad dims or pass smaller tm/tn/tk")
    vmem_limit = int(min(max(2 * fp + (4 << 20), 32 << 20), 64 << 20))

    cost = pl.CostEstimate(
        flops=2 * M * N * K,
        transcendentals=0,
        bytes_accessed=op_bytes * (M * K + N * K) + io_bytes * 2 * M * N,
    )

    if tk == K:
        grid = (M // tm, N // tn)
        grid_spec = pltpu.PrefetchScalarGridSpec(
            num_scalar_prefetch=0,
            grid=grid,
            in_specs=[
                pl.BlockSpec((tm, K), lambda i, j: (i, 0)),    # x  (matmul LHS, bf16)
                pl.BlockSpec((tn, K), lambda i, j: (j, 0)),    # W  (nn.Linear layout, bf16)
                pl.BlockSpec((tm, tn), lambda i, j: (i, j)),   # x  (skip addend, x.dtype)
            ],
            out_specs=pl.BlockSpec((tm, tn), lambda i, j: (i, j)),
        )
        kernel = _skip_fc_kernel_fused_k
        dim_sem = ("parallel", "parallel")
    else:
        grid = (M // tm, N // tn, K // tk)
        grid_spec = pltpu.PrefetchScalarGridSpec(
            num_scalar_prefetch=0,
            grid=grid,
            in_specs=[
                pl.BlockSpec((tm, tk), lambda i, j, k: (i, k)),
                pl.BlockSpec((tn, tk), lambda i, j, k: (j, k)),
                pl.BlockSpec((tm, tn), lambda i, j, k: (i, j)),
            ],
            out_specs=pl.BlockSpec((tm, tn), lambda i, j, k: (i, j)),
            scratch_shapes=[pltpu.VMEM((tm, tn), jnp.float32)],
        )
        kernel = _skip_fc_kernel_ktiled
        dim_sem = ("parallel", "parallel", "arbitrary")

    return pl.pallas_call(
        kernel,
        out_shape=jax.ShapeDtypeStruct((M, N), x.dtype),
        grid_spec=grid_spec,
        compiler_params=pltpu.CompilerParams(
            dimension_semantics=dim_sem,
            vmem_limit_bytes=vmem_limit,
        ),
        cost_estimate=cost,
    )(xm, wm, x)


# --------------------------- pure-JAX reference ---------------------------- #
def reference_forward(x, w, matmul_dtype=jnp.bfloat16):
    """relu(x @ W^T) + x with the same bf16-operand / f32-accumulate numerics."""
    y = jnp.dot(x.astype(matmul_dtype), w.astype(matmul_dtype).T,
                preferred_element_type=jnp.float32)
    out = jnp.maximum(y, 0.0) + x.astype(jnp.float32)
    return out.astype(x.dtype)


if __name__ == "__main__":
    key = jax.random.PRNGKey(0)
    k_x, k_w = jax.random.split(key)

    batch, hidden = 8, 256  # input_dim == output_dim == hidden (skip connection)
    x = jax.random.normal(k_x, (batch, hidden), jnp.float32)
    w = jax.random.normal(k_w, (hidden, hidden), jnp.float32) * (1.0 / jnp.sqrt(hidden))

    ref = reference_forward(x, w)

    # Collapsed-K fast path (auto tiles: tm=8, tn=128, tk=K -> grid (1, 2)).
    out = jax.block_until_ready(skip_fc_forward(x, w))
    assert out.shape == (batch, hidden) and out.dtype == x.dtype
    assert jnp.allclose(out, ref, rtol=1e-3, atol=1e-3), "collapsed-K mismatch vs reference"

    # K-tiled fallback path coverage (tk < K -> accumulator kernel, grid (1, 2, 2)).
    out_kt = jax.block_until_ready(skip_fc_forward(x, w, tm=8, tn=128, tk=128))
    assert jnp.allclose(out_kt, ref, rtol=1e-3, atol=1e-3), "K-tiled mismatch vs reference"

    print("KERNEL_OK")
</pallas_src>

<mosaic_0001>
module attributes {stable_mosaic.version = 11 : i64} {
  func.func @_skip_fc_kernel_fused_k(%arg0: i32, %arg1: i32, %arg2: memref<8x256xbf16, #tpu.memory_space<vmem>>, %arg3: memref<128x256xbf16, #tpu.memory_space<vmem>>, %arg4: memref<8x128xf32, #tpu.memory_space<vmem>>, %arg5: memref<8x128xf32, #tpu.memory_space<vmem>>) attributes {dimension_semantics = [#tpu.dimension_semantics<parallel>, #tpu.dimension_semantics<parallel>], iteration_bounds = array<i64: 1, 2>, scalar_prefetch = 0 : i64, scratch_operands = 0 : i64, tpu.core_type = #tpu.core_type<tc>, window_params = [{transform_indices = @transform_0, window_bounds = array<i64: 8, 256>}, {transform_indices = @transform_1, window_bounds = array<i64: 128, 256>}, {transform_indices = @transform_2, window_bounds = array<i64: 8, 128>}, {transform_indices = @transform_3, window_bounds = array<i64: 8, 128>}]} {
    %c0 = arith.constant 0 : index
    %c0_0 = arith.constant 0 : index
    %0 = vector.load %arg2[%c0, %c0_0] : memref<8x256xbf16, #tpu.memory_space<vmem>>, vector<8x256xbf16>
    %c0_1 = arith.constant 0 : index
    %c0_2 = arith.constant 0 : index
    %1 = vector.load %arg3[%c0_1, %c0_2] : memref<128x256xbf16, #tpu.memory_space<vmem>>, vector<128x256xbf16>
    %cst = arith.constant dense<0.000000e+00> : vector<8x128xf32>
    %2 = tpu.matmul %0, %1, %cst {dimension_numbers = #tpu.dot_dimension_numbers<[1], [1], [0], [0], [0, 0, 1, 0], [], []>} : vector<8x256xbf16>, vector<128x256xbf16>, vector<8x128xf32> -> vector<8x128xf32>
    %cst_3 = arith.constant 0.000000e+00 : f32
    %3 = vector.broadcast %cst_3 : f32 to vector<8x128xf32>
    %4 = arith.maximumf %2, %3 : vector<8x128xf32>
    %c0_4 = arith.constant 0 : index
    %c0_5 = arith.constant 0 : index
    %5 = vector.load %arg4[%c0_4, %c0_5] : memref<8x128xf32, #tpu.memory_space<vmem>>, vector<8x128xf32>
    %6 = arith.addf %4, %5 : vector<8x128xf32>
    %c0_6 = arith.constant 0 : index
    %c0_7 = arith.constant 0 : index
    %7 = vector.load %arg5[%c0_6, %c0_7] : memref<8x128xf32, #tpu.memory_space<vmem>>, vector<8x128xf32>
    tpu.vector_store %arg5[%c0_6, %c0_7], %6 {strides = array<i32>} : memref<8x128xf32, #tpu.memory_space<vmem>>, vector<8x128xf32>,
    return
  }
  func.func @transform_0(%arg0: i32, %arg1: i32) -> (i32, i32) {
    %c0_i32 = arith.constant 0 : i32
    %c0_i32_0 = arith.constant 0 : i32
    return %arg0, %c0_i32 : i32, i32
  }
  func.func @transform_1(%arg0: i32, %arg1: i32) -> (i32, i32) {
    %c0_i32 = arith.constant 0 : i32
    %c0_i32_0 = arith.constant 0 : i32
    return %arg1, %c0_i32 : i32, i32
  }
  func.func @transform_2(%arg0: i32, %arg1: i32) -> (i32, i32) {
    %c0_i32 = arith.constant 0 : i32
    return %arg0, %arg1 : i32, i32
  }
  func.func @transform_3(%arg0: i32, %arg1: i32) -> (i32, i32) {
    %c0_i32 = arith.constant 0 : i32
    return %arg0, %arg1 : i32, i32
  }
}

</mosaic_0001>

<bundles_post_ra>
// kernel: tpu_custom_call.1
= control target key start
LH: loop header
LB: loop body
LE: loop exit
PB: predicated region body
PF: predicated region fallthrough
CT: control target
= control target key end

     0   :  { %8 = vsyncpa [#allocation3], 0  ;;  %s1124_s0 = inlined_call_operand.hbm [shape: bf16[8,256], index: 0, kind: input, shape index: {}]   ;;  %s1125_s1 = inlined_call_operand.hbm [shape: bf16[256,256], index: 1, kind: input, shape index: {}]   ;;  %s1126_s2 = inlined_call_operand.hbm [shape: f32[8,256], index: 2, kind: input, shape index: {}]   ;;  %s1127_s3 = inlined_call_operand.hbm [shape: f32[8,256], index: 3, kind: output, shape index: {}]  }
   0x1   :  { %9 = vsyncpa [#allocation6], 0 }
   0x2   :  { %11 = vsyncpa [#allocation6 + $0x1], 0 }
   0x3   :  { %12 = vsyncpa [#allocation4], 0 }
   0x4   :  { %14 = vsyncpa [#allocation4 + $0x1], 0  ;;  %s921_s12 = smov 0   ;;  %s923_s13 = smov 0  }
   0x5   :  { %s925_s14 = smov 0   ;;  %s927_s15 = smov 0  }
   0x6   :  { %s929_s16 = smov 0   ;;  %s931_s17 = smov 0  }
   0x7 LB: > { %s29_s18 = sadd.s32 1, %s892_s16  ;;  %s65_s19 = sadd.s32 1, %s884_s14  ;;  %s896_s17 = sphi %s931_s17, %s20_s17   ;;  %s892_s16 = sphi %s929_s16, %s1138_s16   ;;  %s888_s15 = sphi %s927_s15, %s1137_s15   ;;  %s884_s14 = sphi %s925_s14, %s1136_s14   ;;  %s880_s13 = sphi %s923_s13, %s1135_s13   ;;  %s876_s12 = sphi %s921_s12, %s1134_s12  }
   0x8   : > { %p30_p0 = scmp.ge.s32.totalorder %s29_s18, 2  ;;  %p72_p1 = scmp.ne.s32.totalorder %s884_s14, %s880_s13 }
   0x9   : > { %p73_p2 = scmp.eq.s32.totalorder %s896_s17, 0  ;;  %p542_p3 = scmp.ge.s32.totalorder %s896_s17, 2 }
   0xa   : > { %s1140_s18 = smov (%p30_p0, %s29_s18), 0  ;;  %p666_p5 = scmp.lt.s32.totalorder %s896_s17, 2 }
   0xb   : > { %p962_p4 = por %p73_p2, %p72_p1  ;;  %s62_s21 = ssub.s32 %s892_s16, %s1140_s18 }
   0xc   : > { %s173_s22 = sand.u32 1, %s896_s17   ;;  %p63_p6 = scmp.eq.s32.totalorder %s62_s21, 0 }
   0xd   : > { %s175_s23 = sand.u32 1, %s884_s14   ;;  %s623_s24 = sshll.u32 %s892_s16, 7 }
   0xe   : > { %s973_s25 = scalar_select %p63_p6, %s884_s14, %s65_s19  }
   0xf   : > { %s543_s26 = sshll.u32 %s175_s23, 7  ;;  %s183_s29 = scalar_lea.hbm %s1125_s1, %s623_s24 }
  0x10   : > { %s184_s30 = sshll.u32 %s183_s29, 4  ;;  %s177_s4 = scalar_lea.vmem [#allocation5], %s543_s26  ;;  %s185_s30 = int_to_ptr.hbm [resolvable:$true] %s184_s30 }
  0x11   : > { %s186_s5 = sshll.u32 %s177_s4, 4  ;;  %p982_p7 = pnand %p666_p5, %p962_p4  ;;  %s187_s5 = int_to_ptr.vmem [resolvable:$true] %s186_s5 }
  0x12   : > { %s986_s7 = scalar_lea.sflag [#allocation6], %s173_s22  ;;  %s898_s8 = smov 128  }
  0x13   : > { %s899_s9 = smov 8   ;;  %s992_s10 = sadd.s32 4294967295, %s896_s17  }
  0x14   : > { %657 = dma.hbm_to_vmem [thread:$0]  (!%p982_p7), %s185_s30, 2048, %s187_s5, %s986_s7, %s898_s8, %s898_s8, %s899_s9  }
  0x15   : > { %s539_s11 = sadd.s32 4294967294, %s896_s17   ;;  %p78_p8 = scmp.ne.s32.totalorder %s880_s13, %s876_s12 }
  0x16   : > { %p79_p9 = scmp.eq.s32.totalorder %s992_s10, 0  ;;  %p132_p10 = scmp.eq.s32.totalorder %s992_s10, 1 }
  0x17   : > { %p138_p11 = scmp.eq.s32.totalorder %s539_s11, 1  ;;  %p540_p12 = scmp.ge.s32.totalorder %s896_s17, 1 }
  0x18   : > { %p1002_p13 = por %p79_p9, %p78_p8  ;;  %p1009_p0 = por %p132_p10, %p72_p1 }
  0x19   : > { %p1013_p2 = por %p138_p11, %p78_p8  ;;  %p145_p4 = scmp.lt.s32.totalorder %s896_s17, 3 }
  0x1a   : > { %s160_s26 = sshll.u32 %s1124_s0, 4  ;;  %s547_s28 = sshll.u32 %s175_s23, 3  ;;  %s161_s26 = int_to_ptr.hbm [resolvable:$true] %s160_s26 }
  0x1b   : > { %p1021_p5 = pnand %p540_p12, %p145_p4  ;;  %s900_s29 = smov [#allocation2]  }
  0x1c   : > { %s162_s30 = sshll.u32 %s900_s29, 4  ;;  %s548_s4 = sshll.u32 %s892_s16, 3  ;;  %s163_s30 = int_to_ptr.vmem [resolvable:$true] %s162_s30 }
  0x1d   : > { %p650_p1 = pneg %p1021_p5  ;;  %s206_s9 = scalar_lea.hbm %s1126_s2, %s548_s4 }
  0x1e   : > { %s200_s11 = scalar_lea.vmem [#allocation7], %s547_s28  ;;  %s208_s24 = sshll.u32 %s206_s9, 4  ;;  %s209_s24 = int_to_ptr.hbm [resolvable:$true] %s208_s24 }
  0x1f   : > { %p651_p6 = pnand %p650_p1, %p79_p9  ;;  %s210_s22 = sshll.u32 %s200_s11, 4  ;;  %s211_s22 = int_to_ptr.vmem [resolvable:$true] %s210_s22 }
  0x20   : > { %660 = dma.hbm_to_vmem [thread:$0]  (!%p982_p7), %s209_s24, 128, %s211_s22, %s986_s7  }
  0x21   : > { %653 = dma.hbm_to_vmem [thread:$0]  (!%p651_p6), %s161_s26, 128, %s163_s30, [#allocation3]  }
  0x22   : > { %219 = sbr.rel (%p1021_p5) target bundleno = 247 (0xf7), region = 32 }
  0x27   : > { %863 = dma.done.wait (%p79_p9), [#allocation3], 128  }
  0x28   : > { %865 = vsyncadd (%p79_p9), [#allocation3], 4294967168  ;;  %s226_s23 = sand.u32 1, %s992_s10   ;;  %s1044_s28 = sand.u32 1, %s880_s13  }
  0x29   : > { %s551_s26 = sshll.u32 %s1044_s28, 7  ;;  %s227_s29 = scalar_lea.sflag [#allocation6], %s226_s23 }
  0x2a   : > { %s1047_s6 = scalar_lea.vmem [#allocation5], %s551_s26 }
  0x2b   : > { %867 = dma.done.wait (%p1002_p13), %s227_s29, 2176  }
  0x2c   : > { %869 = vsyncadd (%p1002_p13), %s227_s29, 4294965120  ;;  %v612_v0 = vld [vmem:[%s1047_s6 + $0x70] sm:$0xf]  ;;  %v639_v1 = vld [vmem:[%s1047_s6 + $0x74] sm:$0xf0]  ;;  %s552_s7 = sshll.u32 %s1044_s28, 3 }
  0x2d   : > { %v638_v2 = vld [vmem:[%s1047_s6 + $0x74] sm:$0xf]  ;;  %v613_v3 = vor.u32 %v639_v1, %v612_v0  ;;  %v614_v4 = vld [vmem:[%s1047_s6 + $0x78] sm:$0xf0]  ;;  %v604_v6 = vld [vmem:[%s1047_s6 + $0x60] sm:$0xf] }
  0x2e   : > { %v617_v5 = vor.u32 %v638_v2, %v614_v4  ;;  %v637_v7 = vld [vmem:[%s1047_s6 + $0x64] sm:$0xf0]  ;;  %v636_v8 = vld [vmem:[%s1047_s6 + $0x64] sm:$0xf]  ;;  %v606_v9 = vld [vmem:[%s1047_s6 + $0x68] sm:$0xf0] }
  0x2f   : > { %374 = vmatpush.bf16.xpose.msra.mxu0 %v613_v3  ;;  %v605_v10 = vor.u32 %v637_v7, %v604_v6  ;;  %v609_v11 = vor.u32 %v636_v8, %v606_v9  ;;  %v596_v12 = vld [vmem:[%s1047_s6 + $0x50] sm:$0xf]  ;;  %v635_v13 = vld [vmem:[%s1047_s6 + $0x54] sm:$0xf0]  ;;  %v634_v14 = vld [vmem:[%s1047_s6 + $0x54] sm:$0xf] }
  0x30   : > { %387 = vmatpush.bf16.xpose.msra.mxu1 %v617_v5  ;;  %v598_v15 = vld [vmem:[%s1047_s6 + $0x58] sm:$0xf0]  ;;  %v597_v16 = vor.u32 %v635_v13, %v596_v12  ;;  %v588_v18 = vld [vmem:[%s1047_s6 + $0x40] sm:$0xf]  ;;  %v633_v19 = vld [vmem:[%s1047_s6 + $0x44] sm:$0xf0] }
  0x31   : > { %v601_v17 = vor.u32 %v634_v14, %v598_v15  ;;  %v632_v20 = vld [vmem:[%s1047_s6 + $0x44] sm:$0xf]  ;;  %v590_v21 = vld [vmem:[%s1047_s6 + $0x48] sm:$0xf0]  ;;  %v589_v22 = vor.u32 %v633_v19, %v588_v18  ;;  %v580_v24 = vld [vmem:[%s1047_s6 + $0x30] sm:$0xf] }
  0x32   : > { %v593_v23 = vor.u32 %v632_v20, %v590_v21  ;;  %v631_v25 = vld [vmem:[%s1047_s6 + $0x34] sm:$0xf0]  ;;  %v630_v26 = vld [vmem:[%s1047_s6 + $0x34] sm:$0xf]  ;;  %v582_v27 = vld [vmem:[%s1047_s6 + $0x38] sm:$0xf0] }
  0x33   : > { %v581_v28 = vor.u32 %v631_v25, %v580_v24  ;;  %v585_v29 = vor.u32 %v630_v26, %v582_v27  ;;  %v572_v30 = vld [vmem:[%s1047_s6 + $0x20] sm:$0xf]  ;;  %v629_v31 = vld [vmem:[%s1047_s6 + $0x24] sm:$0xf0]  ;;  %v628_v32 = vld [vmem:[%s1047_s6 + $0x24] sm:$0xf] }
  0x34   : > { %v574_v33 = vld [vmem:[%s1047_s6 + $0x28] sm:$0xf0]  ;;  %v573_v34 = vor.u32 %v629_v31, %v572_v30  ;;  %v564_v36 = vld [vmem:[%s1047_s6 + $0x10] sm:$0xf]  ;;  %v627_v37 = vld [vmem:[%s1047_s6 + $0x14] sm:$0xf0] }
  0x35   : > { %v577_v35 = vor.u32 %v628_v32, %v574_v33  ;;  %v626_v38 = vld [vmem:[%s1047_s6 + $0x14] sm:$0xf]  ;;  %v566_v39 = vld [vmem:[%s1047_s6 + $0x18] sm:$0xf0]  ;;  %v565_v40 = vor.u32 %v627_v37, %v564_v36  ;;  %v556_v42 = vld [vmem:[%s1047_s6] sm:$0xf] }
  0x36   : > { %v569_v41 = vor.u32 %v626_v38, %v566_v39  ;;  %v625_v43 = vld [vmem:[%s1047_s6 + $0x4] sm:$0xf0]  ;;  %v624_v44 = vld [vmem:[%s1047_s6 + $0x4] sm:$0xf]  ;;  %v558_v45 = vld [vmem:[%s1047_s6 + $0x8] sm:$0xf0] }
  0x37   : > { %375 = vmatpush.bf16.xpose.msra.mxu0 %v605_v10  ;;  %v557_v46 = vor.u32 %v625_v43, %v556_v42  ;;  %v270_v47 = vld [vmem:[#allocation2] sm:$0xff]  ;;  %v561_v48 = vor.u32 %v624_v44, %v558_v45  ;;  %s619_s10 = sshll.u32 %s888_s15, 3  ;;  %s240_s4 = scalar_lea.vmem [#allocation7], %s552_s7 }
  0x38   : > { %388 = vmatpush.bf16.xpose.msra.mxu1 %v609_v11  ;;  %v288_v49 = vunpack.c.l.b16 %v270_v47  ;;  %v289_v50 = vunpack.c.h.b16 %v270_v47  ;;  %s417_s30 = scalar_lea.hbm %s1127_s3, %s619_s10  ;;  %v401_v56 = vld [vmem:[%s240_s4] sm:$0xff]  ;;  %s268_s5 = scalar_lea.vmem [#allocation8], %s552_s7 }
  0x39   : > { %s419_s8 = sshll.u32 %s268_s5, 4  ;;  %s421_s9 = sshll.u32 %s417_s30, 4  ;;  %s420_s8 = int_to_ptr.vmem [resolvable:$true] %s419_s8  ;;  %s422_s9 = int_to_ptr.hbm [resolvable:$true] %s421_s9 }
  0x3a   : > { %v290_v51 = vpack.c.b16 %v288_v49, %v288_v49  ;;  %v291_v52 = vpack.c.b16 %v289_v50, %v289_v50  ;;  %s405_s15 = scalar_lea.sflag [#allocation4], %s1044_s28  ;;  %s824_s11 = sshra.s32 %s422_s9, 4  ;;  %s825_s11 = int_to_ptr.hbm [resolvable:$true] %s824_s11 }
  0x3b   : > { %s826_s22 = scalar_lea.hbm %s825_s11, 8  ;;  %s830_s26 = scalar_lea.hbm %s1127_s3, 16 }
  0x3c   : > { %p827_p7 = scmp.ne.s32.totalorder %s825_s11, %s826_s22  ;;  %p831_p10 = scmp.lt.s32.totalorder %s825_s11, %s1127_s3 }
  0x3d   : > { %p832_p11 = scmp.lt.s32.totalorder %s830_s26, %s826_s22 }
  0x3e   : > { %p828_p8 = pnand %p827_p7, %p1009_p0 }
  0x3f   : > { %376 = vmatpush.bf16.xpose.msra.mxu0 %v597_v16  ;;  %p833_p12 = por %p832_p11, %p831_p10 }
  0x40   : > { %389 = vmatpush.bf16.xpose.msra.mxu1 %v601_v17  ;;  %p829_p9 = pneg %p828_p8 }
  0x42   : > { %p834_p13 = pnand %p833_p12, %p829_p9 }
  0x47   : > { %377 = vmatpush.bf16.xpose.msra.mxu0 %v589_v22 }
  0x48   : > { %390 = vmatpush.bf16.xpose.msra.mxu1 %v593_v23 }
  0x4f   : > { %378 = vmatpush.bf16.xpose.msra.mxu0 %v581_v28 }
  0x50   : > { %391 = vmatpush.bf16.xpose.msra.mxu1 %v585_v29 }
  0x57   : > { %379 = vmatpush.bf16.xpose.msra.mxu0 %v573_v34 }
  0x58   : > { %392 = vmatpush.bf16.xpose.msra.mxu1 %v577_v35 }
  0x5f   : > { %380 = vmatpush.bf16.xpose.msra.mxu0 %v565_v40 }
  0x60   : > { %393 = vmatpush.bf16.xpose.msra.mxu1 %v569_v41 }
  0x67   : > { %381 = vmatpush.bf16.xpose.msra.mxu0 %v557_v46 }
  0x68   : > { %394 = vmatpush.bf16.xpose.msra.mxu1 %v561_v48 }
  0x6e   : > { %382 = vmatmul.bf16.vlgmr.msra.gmra.mxu0 %v290_v51 }
  0x6f   : > { %395 = vmatmul.bf16.vlgmr.msra.gmra.mxu1 %v291_v52 }
  0xeb   : > { %v383_v53 = vpop.f32.mrf.mxu0 }
  0xec   : > { %v396_v54 = vpop.f32.mrf.mxu1 }
  0xed   : > { %v397_v55 = vadd.f32 %v396_v54, %v383_v53 }
  0xef   : > { %v400_v57 = vmax.f32 %v397_v55, 0.0 }
  0xf1   : > { %v402_v58 = vadd.f32 %v401_v56, %v400_v57 }
  0xf3   : > { %v385_v59 = vpop.f32.mrf.mxu0  ;;  %403 = vst [vmem:[%s268_s5] sm:$0xff] %v402_v58 }
  0xf4   : > { %v398_v60 = vpop.f32.mrf.mxu1 }
  0xf5   : > { %837 = shalt.err (!%p834_p13)
}
  0xf6   : > { %648 = dma.vmem_to_hbm [thread:$0]  (%p1009_p0), %s420_s8, 128, %s422_s9, %s405_s15  }
  0xf7 PF: > { %s433_s28 = sand.u32 1, %s876_s12   ;;  %p662_p4 = pnand %p542_p3, %p1013_p2 }
  0xf8   : > { %s434_s7 = scalar_lea.sflag [#allocation4], %s433_s28 }
  0xf9   : > { %p663_p5 = pneg %p662_p4 }
  0xfb   : > { %871 = dma.done.wait (%p663_p5), %s434_s7, 128  }
  0xfc   : > { %873 = vsyncadd (%p663_p5), %s434_s7, 4294967168  ;;  %s20_s17 = sadd.s32 1, %s896_s17   ;;  %s1134_s12 = smov %s880_s13 }
  0xfd   : > { %p17_p1 = scmp.ge.s32.totalorder %s20_s17, 4   ;;  %s1135_s13 = smov %s884_s14 }
  0xfe   : > { %s1136_s14 = smov %s973_s25  ;;  %s1137_s15 = smov %s892_s16 }
  0xff   : > { %s1138_s16 = smov %s1140_s18  ;;  %19 = sbr.rel (!%p17_p1) target bundleno = 7 (0x7), region = 94 }
 0x104   :  { %440 = vsyncpa [#allocation3], 1 }
 0x105   :  { %442 = vsyncpa [#allocation3 + $0x1], 1 }
 0x106   :  { %443 = vsyncpa [#allocation6], 1 }
 0x107   :  { %445 = vsyncpa [#allocation6 + $0x1], 1 }
 0x108   :  { %446 = vsyncpa [#allocation4], 1 }
 0x109   :  { %448 = vsyncpa [#allocation4 + $0x1], 1 }

</bundles_post_ra>
